<compile_context>
chip_gen: v5e
topology: v5e:2x2
jax: 0.10.0
libtpu: 0.0.40
codegen_flags: <defaults>
</compile_context>

<pallas_src>
import functools
import math

import jax
import jax.numpy as jnp
from jax.experimental import pallas as pl
from jax.experimental.pallas import tpu as pltpu

_VMEM = pl.BlockSpec(memory_space=pltpu.MemorySpace.VMEM)
_BN_EPS = 1e-3               # EfficientNet uses batch_norm_epsilon = 1e-3


def _round_up(x, m):
    return (x + m - 1) // m * m


def _pick_vmem_limit():
    # Per-generation scoped-VMEM budget: ~56 MiB on v7x (64 MiB physical),
    # ~112 MiB on v5e/v6e (128 MiB physical).  Fallback: 48 MiB.
    try:
        cap = int(pltpu.get_tpu_info().vmem_capacity_bytes)
        return int(max(32 << 20, min(cap - (8 << 20), 112 << 20)))
    except Exception:
        return 48 << 20


_VMEM_LIMIT = _pick_vmem_limit()


# ------------------- single-K-step matmul + bias + activation -------------------

def _pick_tm(M):
    # Largest row tile that divides M exactly (no activation padding copies);
    # prefer >= 2 grid steps so both v7x TensorCores get work.
    for t in (512, 256, 128, 64, 32, 16, 8):
        if M % t == 0 and M // t >= 2:
            return t
    return M


def _mm_kernel(x_ref, w_ref, b_ref, o_ref, *, act):
    # Single K step (K fits VMEM for every layer here): no accumulator scratch,
    # no zero-fill / reload -- dot straight into the f32 epilogue.
    acc = jnp.dot(x_ref[...], w_ref[...], preferred_element_type=jnp.float32)
    acc = acc + b_ref[...]
    if act == "silu":
        acc = acc * jax.nn.sigmoid(acc)
    elif act == "sigmoid":
        acc = jax.nn.sigmoid(acc)
    o_ref[...] = acc.astype(o_ref.dtype)


def matmul_bias_act(x, w, b, act="none"):
    """x:(M,K) bf16, w:(K,N) bf16 (pre-folded/pre-cast), b:(1,N) f32 -> (M,N) bf16.

    Grid only over M rows; K and N are full-extent blocks (allowed even when not
    multiples of 128 since the block equals the full dim).  No wrapper-side
    pad / cast / crop of activations."""
    M, K = x.shape
    N = w.shape[1]
    tm = _pick_tm(M)
    # TODO(synk): add a K-tiled accumulator path if K ever exceeds VMEM.
    return pl.pallas_call(
        functools.partial(_mm_kernel, act=act),
        grid_spec=pltpu.PrefetchScalarGridSpec(
            num_scalar_prefetch=0, grid=(M // tm,),
            in_specs=[pl.BlockSpec((tm, K), lambda i: (i, 0)),
                      pl.BlockSpec((K, N), lambda i: (0, 0)),
                      pl.BlockSpec((1, N), lambda i: (0, 0))],
            out_specs=pl.BlockSpec((tm, N), lambda i: (i, 0))),
        out_shape=jax.ShapeDtypeStruct((M, N), jnp.bfloat16),
        compiler_params=pltpu.CompilerParams(
            dimension_semantics=("parallel",),
            vmem_limit_bytes=_VMEM_LIMIT),
        cost_estimate=pl.CostEstimate(
            flops=2 * M * N * K,
            transcendentals=M * N if act != "none" else 0,
            bytes_accessed=2 * M * K + 2 * K * N + 4 * N + 2 * M * N),
    )(x, w, b)


# --------- depthwise 3x3 conv + BN + SiLU, fused SE global-avg-pool ---------

def _dw_s1_kernel(x_ref, w_ref, b_ref, o_ref, m_ref):
    # x_ref: (1, H+2, W+2, C) bf16 padded input (read once); 9 unit-stride taps.
    _, Ho, Wo, C = o_ref.shape
    x = x_ref[0].astype(jnp.float32)      # one convert; f32 taps (v5e-safe VPU)
    w = w_ref[...]
    acc = None
    t = 0
    for ki in range(3):
        for kj in range(3):
            tap = x[ki:ki + Ho, kj:kj + Wo, :] * w[t].reshape(1, 1, C)
            acc = tap if acc is None else acc + tap   # first tap inits (no zeros)
            t += 1
    acc = acc + b_ref[...].reshape(1, 1, C)
    acc = acc * jax.nn.sigmoid(acc)                           # SiLU
    o_ref[...] = acc[None].astype(o_ref.dtype)                # bf16 out
    m_ref[...] = jnp.mean(acc, axis=(0, 1), keepdims=True)    # fused SE GAP (f32)


def _dw_s2_kernel(p00_ref, p01_ref, p10_ref, p11_ref, w_ref, b_ref, o_ref, m_ref):
    # Stride-2: even/odd phase inputs -> all taps are unit-stride slices.
    _, Ho, Wo, C = o_ref.shape
    ph = ((p00_ref[0].astype(jnp.float32), p01_ref[0].astype(jnp.float32)),
          (p10_ref[0].astype(jnp.float32), p11_ref[0].astype(jnp.float32)))
    w = w_ref[...]
    acc = None
    t = 0
    for ki in range(3):
        for kj in range(3):
            src = ph[ki % 2][kj % 2]
            tap = src[ki // 2:ki // 2 + Ho,
                      kj // 2:kj // 2 + Wo, :] * w[t].reshape(1, 1, C)
            acc = tap if acc is None else acc + tap
            t += 1
    acc = acc + b_ref[...].reshape(1, 1, C)
    acc = acc * jax.nn.sigmoid(acc)
    o_ref[...] = acc[None].astype(o_ref.dtype)
    m_ref[...] = jnp.mean(acc, axis=(0, 1), keepdims=True)


def dwconv_se_gap(x, w9, b1, *, stride):
    """3x3 depthwise conv (pad=1, pre-folded BN, SiLU) fused with the SE
    global-average-pool; gridded over batch.  x bf16 -> (y bf16, gap f32)."""
    N, H, W, C = x.shape
    cparams = pltpu.CompilerParams(dimension_semantics=("parallel",),
                                   vmem_limit_bytes=_VMEM_LIMIT)
    # TODO(synk): for real (>=56x56) resolutions on v7x, tile over H rows with a
    # 2-row halo (GAP accumulated with @pl.when) instead of whole-image blocks.
    if stride == 1:
        Ho, Wo = H, W
        xp = jnp.pad(x, ((0, 0), (1, 1), (1, 1), (0, 0)))
        out, m = pl.pallas_call(
            _dw_s1_kernel,
            grid_spec=pltpu.PrefetchScalarGridSpec(
                num_scalar_prefetch=0, grid=(N,),
                in_specs=[pl.BlockSpec((1, H + 2, W + 2, C), lambda n: (n, 0, 0, 0)),
                          pl.BlockSpec((9, C), lambda n: (0, 0)),
                          pl.BlockSpec((1, C), lambda n: (0, 0))],
                out_specs=[pl.BlockSpec((1, Ho, Wo, C), lambda n: (n, 0, 0, 0)),
                           pl.BlockSpec((1, 1, C), lambda n: (n, 0, 0))]),
            out_shape=(jax.ShapeDtypeStruct((N, Ho, Wo, C), jnp.bfloat16),
                       jax.ShapeDtypeStruct((N, 1, C), jnp.float32)),
            compiler_params=cparams,
        )(xp, w9, b1)
    else:  # stride == 2
        Ho = (H - 1) // 2 + 1
        Wo = (W - 1) // 2 + 1
        # TODO(synk): the phase decomposition is still materialized by XLA
        # (bf16 now, so half the old bytes); writing the expand conv output
        # directly into phased layout would remove this copy entirely.
        xp = jnp.pad(x, ((0, 0), (1, 1 + H % 2), (1, 1 + W % 2), (0, 0)))
        phases = [xp[:, a::2, b::2, :] for a in (0, 1) for b in (0, 1)]
        Hp, Wp = phases[0].shape[1], phases[0].shape[2]       # == Ho+1, Wo+1
        out, m = pl.pallas_call(
            _dw_s2_kernel,
            grid_spec=pltpu.PrefetchScalarGridSpec(
                num_scalar_prefetch=0, grid=(N,),
                in_specs=[pl.BlockSpec((1, Hp, Wp, C), lambda n: (n, 0, 0, 0))] * 4
                         + [pl.BlockSpec((9, C), lambda n: (0, 0)),
                            pl.BlockSpec((1, C), lambda n: (0, 0))],
                out_specs=[pl.BlockSpec((1, Ho, Wo, C), lambda n: (n, 0, 0, 0)),
                           pl.BlockSpec((1, 1, C), lambda n: (n, 0, 0))]),
            out_shape=(jax.ShapeDtypeStruct((N, Ho, Wo, C), jnp.bfloat16),
                       jax.ShapeDtypeStruct((N, 1, C), jnp.float32)),
            compiler_params=cparams,
        )(*phases, w9, b1)
    return out, m


# ------- fused SE-MLP + gate-folded projection 1x1 conv (+ residual add) -------

def _proj_kernel(x_ref, gap_ref, w1_ref, b1_ref, w2_ref, b2_ref, w_ref, b_ref,
                 *rest, has_res):
    if has_res:
        r_ref, o_ref = rest
    else:
        (o_ref,) = rest
    Cexp = w_ref.shape[0]
    # SE MLP fused: (1,Cexp) pooled -> gate (1,Cexp).
    gap = gap_ref[0]
    h = jnp.dot(gap, w1_ref[...], preferred_element_type=jnp.float32) + b1_ref[...]
    h = h * jax.nn.sigmoid(h)
    g = jnp.dot(h, w2_ref[...], preferred_element_type=jnp.float32) + b2_ref[...]
    gate = jax.nn.sigmoid(g)
    # Fold the gate into the projection weight: (x*g) @ W == x @ (diag(g) @ W).
    # diag(g) is built with an iota mask + tiny MXU matmul so the big HWxCexp
    # activation never gets rescaled/cast (it stays bf16 straight from HBM).
    gb = jnp.broadcast_to(gate, (Cexp, Cexp))
    ri = jax.lax.broadcasted_iota(jnp.int32, (Cexp, Cexp), 0)
    ci = jax.lax.broadcasted_iota(jnp.int32, (Cexp, Cexp), 1)
    diag_g = jnp.where(ri == ci, gb, 0.0)
    w_eff = jnp.dot(diag_g, w_ref[...],
                    preferred_element_type=jnp.float32).astype(jnp.bfloat16)
    acc = jnp.dot(x_ref[0], w_eff, preferred_element_type=jnp.float32) + b_ref[...]
    if has_res:
        acc = acc + r_ref[0].astype(jnp.float32)              # residual fused
    o_ref[...] = acc[None].astype(o_ref.dtype)                # bf16 out


def proj_se_res(x, gap, q, residual=None):
    """y = x @ (diag(se_gate(gap)) @ W_proj) + folded-BN bias [+ residual]."""
    N, Ho, Wo, Cexp = x.shape
    Cout = q["proj_w"].shape[1]
    hp = q["se_w1"].shape[1]
    HW = Ho * Wo
    xf = x.reshape(N, HW, Cexp)
    inputs = [xf, gap, q["se_w1"], q["se_b1"], q["se_w2"], q["se_b2"],
              q["proj_w"], q["proj_b"]]
    in_specs = [pl.BlockSpec((1, HW, Cexp), lambda n: (n, 0, 0)),
                pl.BlockSpec((1, 1, Cexp), lambda n: (n, 0, 0)),
                pl.BlockSpec((Cexp, hp), lambda n: (0, 0)),
                pl.BlockSpec((1, hp), lambda n: (0, 0)),
                pl.BlockSpec((hp, Cexp), lambda n: (0, 0)),
                pl.BlockSpec((1, Cexp), lambda n: (0, 0)),
                pl.BlockSpec((Cexp, Cout), lambda n: (0, 0)),
                pl.BlockSpec((1, Cout), lambda n: (0, 0))]
    has_res = residual is not None
    if has_res:
        inputs.append(residual.reshape(N, HW, Cout))
        in_specs.append(pl.BlockSpec((1, HW, Cout), lambda n: (n, 0, 0)))
    out = pl.pallas_call(
        functools.partial(_proj_kernel, has_res=has_res),
        grid_spec=pltpu.PrefetchScalarGridSpec(
            num_scalar_prefetch=0, grid=(N,),
            in_specs=in_specs,
            out_specs=pl.BlockSpec((1, HW, Cout), lambda n: (n, 0, 0))),
        out_shape=jax.ShapeDtypeStruct((N, HW, Cout), jnp.bfloat16),
        compiler_params=pltpu.CompilerParams(
            dimension_semantics=("parallel",),
            vmem_limit_bytes=_VMEM_LIMIT),
    )(*inputs)
    return out.reshape(N, Ho, Wo, Cout)


# -------------------- global-avg-pool + batched Linear head --------------------

def _gap_kernel(x_ref, o_ref):
    o_ref[...] = jnp.mean(x_ref[0].astype(jnp.float32), axis=0, keepdims=True)


def _fc_kernel(x_ref, w_ref, b_ref, o_ref):
    o_ref[...] = (jnp.dot(x_ref[...], w_ref[...],
                          preferred_element_type=jnp.float32) + b_ref[...])


def gap_fc(x, w, b):
    """Per-image GAP (grid over batch) then ONE batched (N,C)@(C,D) Linear."""
    N, H, W, C = x.shape
    pooled = pl.pallas_call(
        _gap_kernel,
        grid_spec=pltpu.PrefetchScalarGridSpec(
            num_scalar_prefetch=0, grid=(N,),
            in_specs=[pl.BlockSpec((1, H * W, C), lambda n: (n, 0, 0))],
            out_specs=pl.BlockSpec((1, C), lambda n: (n, 0))),
        out_shape=jax.ShapeDtypeStruct((N, C), jnp.float32),
        compiler_params=pltpu.CompilerParams(
            dimension_semantics=("parallel",),
            vmem_limit_bytes=_VMEM_LIMIT),
    )(x.reshape(N, H * W, C))
    return pl.pallas_call(
        _fc_kernel,
        in_specs=[_VMEM, _VMEM, _VMEM], out_specs=_VMEM,
        out_shape=jax.ShapeDtypeStruct((N, w.shape[1]), jnp.float32),
    )(pooled, w, b)


# ------------------------------ glue (JAX) --------------------------------

def _fold_bn(gamma, beta, mean, var):
    scale = gamma / jnp.sqrt(var + _BN_EPS)
    return scale, beta - mean * scale


def _im2col(x, k, stride, pad):
    N, H, W, C = x.shape
    xp = jnp.pad(x, ((0, 0), (pad, pad), (pad, pad), (0, 0)))
    Ho = (H + 2 * pad - k) // stride + 1
    Wo = (W + 2 * pad - k) // stride + 1
    cols = []
    for ki in range(k):
        for kj in range(k):
            cols.append(xp[:, ki:ki + (Ho - 1) * stride + 1:stride,
                           kj:kj + (Wo - 1) * stride + 1:stride, :])
    patches = jnp.concatenate(cols, axis=-1)  # (N, Ho, Wo, k*k*C), bf16
    return patches.reshape(N * Ho * Wo, k * k * C), (N, Ho, Wo)


def mbconv(x, q):
    N, H, W, Cin = x.shape
    h = x
    if q["has_expand"]:
        Cexp = q["expand_w"].shape[1]
        h = matmul_bias_act(h.reshape(N * H * W, Cin), q["expand_w"],
                            q["expand_b"], act="silu").reshape(N, H, W, Cexp)
    h, gap = dwconv_se_gap(h, q["dw_w9"], q["dw_b"], stride=q["stride"])
    res = x if q["has_res"] else None
    return proj_se_res(h, gap, q, residual=res)


# --------------------------- parameters / model ----------------------------

def init_params(seed, output_dimensions):
    key = [jax.random.PRNGKey(seed)]

    def nxt():
        key[0], sub = jax.random.split(key[0])
        return sub

    def conv_w(cout, cin, k):
        fan_in = cin * k * k
        return jax.random.normal(nxt(), (cout, cin, k, k), jnp.float32) / math.sqrt(fan_in)

    def bn(c):
        gamma = 1.0 + 0.1 * jax.random.normal(nxt(), (c,), jnp.float32)
        beta = 0.05 * jax.random.normal(nxt(), (c,), jnp.float32)
        mean = 0.05 * jax.random.normal(nxt(), (c,), jnp.float32)
        var = 0.9 + 0.2 * jax.random.uniform(nxt(), (c,), jnp.float32)
        return (gamma, beta, mean, var)

    def linear(cin, cout):
        w = jax.random.normal(nxt(), (cin, cout), jnp.float32) / math.sqrt(cin)
        b = 0.01 * jax.random.normal(nxt(), (1, cout), jnp.float32)
        return w, b

    params = {}
    params["stem_w"] = conv_w(16, 3, 3)
    params["stem_bn"] = bn(16)

    block_cfg = [
        dict(cin=16, cout=24, expand=4, stride=1),
        dict(cin=24, cout=40, expand=4, stride=2),
        dict(cin=40, cout=40, expand=4, stride=1),
    ]
    params["block_cfg"] = block_cfg
    blocks = []
    for cfg in block_cfg:
        cin, cout, expand = cfg["cin"], cfg["cout"], cfg["expand"]
        cexp = cin * expand
        se_dim = max(1, cin // 4)
        p = {}
        if expand != 1:
            p["expand_w"] = conv_w(cexp, cin, 1)
            p["expand_bn"] = bn(cexp)
        p["dw_w"] = conv_w(cexp, 1, 3)
        p["dw_bn"] = bn(cexp)
        p["se_w1"], p["se_b1"] = linear(cexp, se_dim)
        p["se_w2"], p["se_b2"] = linear(se_dim, cexp)
        p["proj_w"] = conv_w(cout, cexp, 1)
        p["proj_bn"] = bn(cout)
        blocks.append(p)
    params["blocks"] = blocks

    params["head_w"] = conv_w(128, 40, 1)
    params["head_bn"] = bn(128)
    params["fc_w"], params["fc_b"] = linear(128, output_dimensions)
    return params


def prepare_params(params):
    """Fold BN, transpose to matmul layout, pad the SE hidden dim, and cast
    MXU weights to bf16 ONCE (no per-forward weight preparation)."""
    prep = {}

    scale, bias = _fold_bn(*params["stem_bn"])
    w = jnp.transpose(params["stem_w"], (2, 3, 1, 0)).reshape(27, 16) * scale[None, :]
    prep["stem_w"] = w.astype(jnp.bfloat16)
    prep["stem_b"] = bias[None, :].astype(jnp.float32)

    blocks = []
    for cfg, p in zip(params["block_cfg"], params["blocks"]):
        q = {"stride": cfg["stride"],
             "has_expand": "expand_w" in p,
             "has_res": cfg["stride"] == 1 and cfg["cin"] == cfg["cout"]}
        if q["has_expand"]:
            scale, bias = _fold_bn(*p["expand_bn"])
            w = jnp.transpose(p["expand_w"][:, :, 0, 0], (1, 0)) * scale[None, :]
            q["expand_w"] = w.astype(jnp.bfloat16)
            q["expand_b"] = bias[None, :].astype(jnp.float32)
        scale, bias = _fold_bn(*p["dw_bn"])
        C = p["dw_w"].shape[0]
        q["dw_w9"] = (jnp.transpose(p["dw_w"][:, 0], (1, 2, 0)).reshape(9, C)
                      * scale[None, :]).astype(jnp.float32)
        q["dw_b"] = bias[None, :].astype(jnp.float32)
        hid = p["se_w1"].shape[1]
        hp = _round_up(hid, 128)                      # lane-dense SE hidden
        q["se_w1"] = jnp.pad(p["se_w1"], ((0, 0), (0, hp - hid))).astype(jnp.float32)
        q["se_b1"] = jnp.pad(p["se_b1"], ((0, 0), (0, hp - hid))).astype(jnp.float32)
        q["se_w2"] = jnp.pad(p["se_w2"], ((0, hp - hid), (0, 0))).astype(jnp.float32)
        q["se_b2"] = p["se_b2"].astype(jnp.float32)
        scale, bias = _fold_bn(*p["proj_bn"])
        q["proj_w"] = (jnp.transpose(p["proj_w"][:, :, 0, 0], (1, 0))
                       * scale[None, :]).astype(jnp.float32)
        q["proj_b"] = bias[None, :].astype(jnp.float32)
        blocks.append(q)
    prep["blocks"] = blocks

    scale, bias = _fold_bn(*params["head_bn"])
    prep["head_w"] = (jnp.transpose(params["head_w"][:, :, 0, 0], (1, 0))
                      * scale[None, :]).astype(jnp.bfloat16)
    prep["head_b"] = bias[None, :].astype(jnp.float32)
    prep["fc_w"] = params["fc_w"].astype(jnp.float32)
    prep["fc_b"] = params["fc_b"].astype(jnp.float32)
    return prep


def efficientnet_forward(prep, x_nchw):
    """x_nchw: (N, 3, H, W) float32 (PyTorch layout) -> logits (N, out_dims)."""
    x = jnp.transpose(x_nchw, (0, 2, 3, 1)).astype(jnp.bfloat16)  # NCHW->NHWC, bf16
    # stem: conv3x3 stride 2 + folded BN + SiLU (im2col only for 3-ch stem)
    cols, (n, ho, wo) = _im2col(x, 3, 2, 1)
    cstem = prep["stem_w"].shape[1]
    x = matmul_bias_act(cols, prep["stem_w"], prep["stem_b"],
                        act="silu").reshape(n, ho, wo, cstem)
    # MBConv blocks (expand -> depthwise+GAP -> fused SE/proj/residual)
    for q in prep["blocks"]:
        x = mbconv(x, q)
    # head: conv1x1 + folded BN + SiLU, then GAP + batched Linear
    n, h, w, c = x.shape
    chead = prep["head_w"].shape[1]
    x = matmul_bias_act(x.reshape(n * h * w, c), prep["head_w"], prep["head_b"],
                        act="silu").reshape(n, h, w, chead)
    logits = gap_fc(x, prep["fc_w"], prep["fc_b"])
    return logits


if __name__ == "__main__":
    output_dimensions = 10
    key = jax.random.PRNGKey(0)
    x = jax.random.normal(key, (2, 3, 16, 16), jnp.float32)  # NCHW, as in PyTorch
    raw = init_params(0, output_dimensions)
    prep = prepare_params(raw)        # BN fold / transpose / pad / bf16 cast ONCE
    out = efficientnet_forward(prep, x)
    out = jax.block_until_ready(out)
    assert out.shape == (2, output_dimensions)
    assert bool(jnp.all(jnp.isfinite(out)))
    print("KERNEL_OK")
</pallas_src>

<mosaic_0001>
module attributes {stable_mosaic.version = 11 : i64} {
  func.func @_mm_kernel(%arg0: i32, %arg1: memref<64x27xbf16, #tpu.memory_space<vmem>>, %arg2: memref<27x16xbf16, #tpu.memory_space<vmem>>, %arg3: memref<1x16xf32, #tpu.memory_space<vmem>>, %arg4: memref<64x16xbf16, #tpu.memory_space<vmem>>) attributes {dimension_semantics = [#tpu.dimension_semantics<parallel>], iteration_bounds = array<i64: 2>, scalar_prefetch = 0 : i64, scratch_operands = 0 : i64, tpu.core_type = #tpu.core_type<tc>, window_params = [{transform_indices = @transform_0, window_bounds = array<i64: 64, 27>}, {pipeline_mode = #tpu.pipeline_mode<synchronous>, transform_indices = @transform_1, window_bounds = array<i64: 27, 16>}, {pipeline_mode = #tpu.pipeline_mode<synchronous>, transform_indices = @transform_2, window_bounds = array<i64: 1, 16>}, {transform_indices = @transform_3, window_bounds = array<i64: 64, 16>}]} {
    %c0 = arith.constant 0 : index
    %c0_0 = arith.constant 0 : index
    %0 = vector.load %arg1[%c0, %c0_0] : memref<64x27xbf16, #tpu.memory_space<vmem>>, vector<64x27xbf16>
    %c0_1 = arith.constant 0 : index
    %c0_2 = arith.constant 0 : index
    %1 = vector.load %arg2[%c0_1, %c0_2] : memref<27x16xbf16, #tpu.memory_space<vmem>>, vector<27x16xbf16>
    %cst = arith.constant dense<0.000000e+00> : vector<64x16xf32>
    %2 = tpu.matmul %0, %1, %cst {dimension_numbers = #tpu.dot_dimension_numbers<[1], [0], [0], [1], [0, 0, 1, 1], [], []>} : vector<64x27xbf16>, vector<27x16xbf16>, vector<64x16xf32> -> vector<64x16xf32>
    %c0_3 = arith.constant 0 : index
    %c0_4 = arith.constant 0 : index
    %3 = vector.load %arg3[%c0_3, %c0_4] : memref<1x16xf32, #tpu.memory_space<vmem>>, vector<1x16xf32>
    %4 = vector.broadcast %3 : vector<1x16xf32> to vector<64x16xf32>
    %5 = arith.addf %2, %4 : vector<64x16xf32>
    %6 = arith.negf %5 : vector<64x16xf32>
    %7 = math.exp %6 : vector<64x16xf32>
    %cst_5 = arith.constant 1.000000e+00 : f32
    %8 = vector.broadcast %cst_5 : f32 to vector<64x16xf32>
    %9 = arith.addf %8, %7 : vector<64x16xf32>
    %10 = arith.divf %8, %9 : vector<64x16xf32>
    %11 = arith.mulf %5, %10 : vector<64x16xf32>
    %12 = arith.truncf %11 : vector<64x16xf32> to vector<64x16xbf16>
    %c0_6 = arith.constant 0 : index
    %c0_7 = arith.constant 0 : index
    %13 = vector.load %arg4[%c0_6, %c0_7] : memref<64x16xbf16, #tpu.memory_space<vmem>>, vector<64x16xbf16>
    tpu.vector_store %arg4[%c0_6, %c0_7], %12 {strides = array<i32>} : memref<64x16xbf16, #tpu.memory_space<vmem>>, vector<64x16xbf16>,
    return
  }
  func.func @transform_0(%arg0: i32) -> (i32, i32) {
    %c0_i32 = arith.constant 0 : i32
    %c0_i32_0 = arith.constant 0 : i32
    return %arg0, %c0_i32 : i32, i32
  }
  func.func @transform_1(%arg0: i32) -> (i32, i32) {
    %c0_i32 = arith.constant 0 : i32
    %c0_i32_0 = arith.constant 0 : i32
    %c0_i32_1 = arith.constant 0 : i32
    return %c0_i32, %c0_i32_0 : i32, i32
  }
  func.func @transform_2(%arg0: i32) -> (i32, i32) {
    %c0_i32 = arith.constant 0 : i32
    %c0_i32_0 = arith.constant 0 : i32
    %c0_i32_1 = arith.constant 0 : i32
    return %c0_i32, %c0_i32_0 : i32, i32
  }
  func.func @transform_3(%arg0: i32) -> (i32, i32) {
    %c0_i32 = arith.constant 0 : i32
    %c0_i32_0 = arith.constant 0 : i32
    return %arg0, %c0_i32 : i32, i32
  }
}

</mosaic_0001>

<bundles_post_ra>
// kernel: tpu_custom_call.1
= control target key start
LH: loop header
LB: loop body
LE: loop exit
PB: predicated region body
PF: predicated region fallthrough
CT: control target
= control target key end

     0   :  { %s634_s12 = smov 0   ;;  %s799_s0 = inlined_call_operand.vmem [shape: bf16[128,27], index: 0, kind: input, shape index: {}]   ;;  %s800_s1 = inlined_call_operand.vmem [shape: bf16[27,16], index: 1, kind: input, shape index: {}]   ;;  %s801_s2 = inlined_call_operand.vmem [shape: f32[1,16], index: 2, kind: input, shape index: {}]   ;;  %s802_s3 = inlined_call_operand.vmem [shape: bf16[128,16], index: 3, kind: output, shape index: {}]  }
   0x1 LB: > { %s504_s13 = sadd.s32 4294967295, %s611_s12   ;;  %p508_p0 = scmp.ge.s32.totalorder %s611_s12, 1  ;;  %s611_s12 = sphi %s634_s12, %s13_s12  }
   0x2   : > { %p138_p1 = scmp.lt.s32.totalorder %s611_s12, 3 }
   0x4   : > { %p139_p2 = pnand %p508_p0, %p138_p1 }
   0x5   : > { %s509_s18 = sshll.u32 (!%p139_p2), %s504_s13, 3 }
   0x6   : > { %142 = sbr.rel (%p139_p2) target bundleno = 207 (0xcf), region = 32  ;;  %p163_p3 = scmp.lt.s32.totalorder (!%p139_p2), %s509_s18, 15 }
   0xb   : > { %v535_v0 = vld [vmem:[%s800_s1 + $0x8] sm:$0xf]  ;;  %v556_v1 = vld [vmem:[%s800_s1 + $0x8] sm:$0x30]  ;;  %vm235_vm0 = vcmask 1044480   ;;  %vm236_vm1 = vcmask 1045504  }
   0xc   : > { %v536_v2 = vor.u32 %v556_v1, %v535_v0  ;;  %v613_v3 = vmov 65535   ;;  %s812_s18 = smov (!%p163_p3, %s509_s18), 15  ;;  %v555_v7 = vld [vmem:[%s800_s1] sm:$0xff]  ;;  %vm222_vm2 = vcmask 220160   ;;  %vm439_vm7 = vcmask 125952  }
   0xd   : > { %v237_v4 = vsel %vm235_vm0, 4294967295, %v613_v3  ;;  %s510_s21 = sshll.u32 %s812_s18, 2  ;;  %v572_v12 = vld [vmem:[%s801_s2] ss:$0 sm:$0xff] }
   0xe   : > { %v238_v5 = vsel %vm236_vm1, %v237_v4, 0  ;;  %s166_s24 = scalar_lea.vmem %s799_s0, %s510_s21  ;;  %s736_s29 = scalar_lea.vmem %s802_s3, %s510_s21 }
   0xf   : > { %v240_v6 = vand.u32 %v536_v2, %v238_v5  ;;  %v551_v8 = vld [vmem:[%s166_s24] sm:$0xff]  ;;  %v552_v9 = vld [vmem:[%s166_s24 + $0x8] sm:$0xff]  ;;  %v553_v10 = vld [vmem:[%s166_s24 + $0x10] sm:$0xff] }
  0x10   : > { %v554_v11 = vld [vmem:[%s166_s24 + $0x18] sm:$0xff] }
  0x11   : > { %248 = vmatpush.bf16.msra.mxu0 %v240_v6  ;;  %557 = vmatpush.bf16.msra.mxu1 %v240_v6 }
  0x12   : > { %558 = vmatpush.bf16.msra.mxu2 %v240_v6  ;;  %559 = vmatpush.bf16.msra.mxu3 %v240_v6 }
  0x15   : > { %249 = vmatpush.bf16.msra.mxu0 %v555_v7  ;;  %560 = vmatpush.bf16.msra.mxu1 %v555_v7 }
  0x16   : > { %561 = vmatpush.bf16.msra.mxu2 %v555_v7  ;;  %562 = vmatpush.bf16.msra.mxu3 %v555_v7 }
  0x18   : > { %537 = vmatmul.msk.bf16.vlgmr.msra.gmra.mxu0 %vm222_vm2, %v551_v8  ;;  %538 = vmatmul.msk.bf16.vlgmr.msra.gmra.mxu1 %vm222_vm2, %v552_v9 }
  0x19   : > { %539 = vmatmul.msk.bf16.vlgmr.msra.gmra.mxu2 %vm222_vm2, %v553_v10  ;;  %540 = vmatmul.msk.bf16.vlgmr.msra.gmra.mxu3 %vm222_vm2, %v554_v11 }
  0x95   : > { %v251_v13 = vpop.f32.mrf.mxu0  ;;  %v256_v14 = vpop.f32.mrf.mxu1 }
  0x96   : > { %v662_v15 = vadd.f32 %v572_v12, %v251_v13  ;;  %v664_v16 = vadd.f32 %v572_v12, %v256_v14 }
  0x98   : > { %v541_v17 = vmul.f32 -1.442695, %v662_v15  ;;  %v543_v18 = vmul.f32 -1.442695, %v664_v16 }
  0x9a   : > { %573 = vpow2.f32 %v541_v17 }
  0x9b   : > { %575 = vpow2.f32 %v543_v18 }
  0x9c   : > { %v261_v19 = vpop.f32.mrf.mxu2  ;;  %v266_v20 = vpop.f32.mrf.mxu3 }
  0x9d   : > { %v668_v21 = vadd.f32 %v572_v12, %v261_v19  ;;  %v670_v22 = vadd.f32 %v572_v12, %v266_v20  ;;  %v253_v23 = vpop.f32.mrf.mxu0  ;;  %v258_v24 = vpop.f32.mrf.mxu1 }
  0x9e   : > { %v672_v25 = vadd.f32 %v572_v12, %v253_v23  ;;  %v674_v26 = vadd.f32 %v572_v12, %v258_v24 }
  0x9f   : > { %v545_v27 = vmul.f32 -1.442695, %v668_v21  ;;  %v547_v28 = vmul.f32 -1.442695, %v670_v22 }
  0xa0   : > { %v574_v29 = vpop.eup %573  ;;  %v542_v32 = vmul.f32 -1.442695, %v672_v25  ;;  %v544_v34 = vmul.f32 -1.442695, %v674_v26 }
  0xa1   : > { %v576_v30 = vpop.eup %575  ;;  %v295_v31 = vadd.f32 1.0, %v574_v29  ;;  %577 = vpow2.f32 %v545_v27 }
  0xa2   : > { %v297_v33 = vadd.f32 1.0, %v576_v30  ;;  %579 = vpow2.f32 %v547_v28 }
  0xa3   : > { %581 = vrcp.f32 %v295_v31  ;;  %v312_v41 = vand.u32 2147483647, %v295_v31  ;;  %v314_v42 = vand.u32 2147483648, %v295_v31  ;;  %vm308_vm3 = vweird.f32 %v295_v31 }
  0xa4   : > { %583 = vrcp.f32 %v297_v33  ;;  %v263_v35 = vpop.f32.mrf.mxu2  ;;  %v268_v36 = vpop.f32.mrf.mxu3  ;;  %v342_v45 = vand.u32 2147483647, %v297_v33  ;;  %vm338_vm4 = vweird.f32 %v297_v33  ;;  %v344_v52 = vand.u32 2147483648, %v297_v33 }
  0xa5   : > { %585 = vpow2.f32 %v542_v32  ;;  %v680_v37 = vadd.f32 %v572_v12, %v263_v35  ;;  %v682_v39 = vadd.f32 %v572_v12, %v268_v36  ;;  %vm691_vm5 = vcmp.eq.f32.partialorder %v312_v41, 8.507059e+37 }
  0xa6   : > { %587 = vpow2.f32 %v544_v34  ;;  %v315_v57 = vor.u32 1.1754944e-38, %v314_v42  ;;  %vm696_vm8 = vcmp.eq.f32.partialorder %v342_v45, 8.507059e+37  ;;  %v345_v1 = vor.u32 1.1754944e-38, %v344_v52 }
  0xa7   : > { %v578_v38 = vpop.eup %577  ;;  %v546_v47 = vmul.f32 -1.442695, %v680_v37  ;;  %v548_v53 = vmul.f32 -1.442695, %v682_v39 }
  0xa8   : > { %v580_v40 = vpop.eup %579  ;;  %v684_v43 = vadd.f32 1.0, %v578_v38 }
  0xa9   : > { %v582_v44 = vpop.eup %581  ;;  %v686_v46 = vadd.f32 1.0, %v580_v40 }
  0xaa   : > { %v584_v48 = vpop.eup %583  ;;  %v304_v49 = vmul.f32 %v582_v44, %v295_v31  ;;  %589 = vrcp.f32 %v684_v43  ;;  %vm309_vm6 = vweird.f32 %v582_v44  ;;  %v372_v61 = vand.u32 2147483647, %v684_v43 }
  0xab   : > { %v586_v50 = vpop.eup %585  ;;  %v334_v51 = vmul.f32 %v584_v48, %v297_v33  ;;  %591 = vrcp.f32 %v686_v46  ;;  %vm339_vm9 = vweird.f32 %v584_v48  ;;  %v374_v4 = vand.u32 2147483648, %v684_v43  ;;  %vm310_vm10 = vmor %vm308_vm3, %vm309_vm6 }
  0xac   : > { %v588_v54 = vpop.eup %587  ;;  %v305_v55 = vsub.f32 1.0, %v304_v49  ;;  %593 = vpow2.f32 %v546_v47  ;;  %v701_v62 = vadd.f32 1.0, %v586_v50  ;;  %v402_v5 = vand.u32 2147483647, %v686_v46  ;;  %vm340_vm13 = vmor %vm338_vm4, %vm339_vm9 }
  0xad   : > { %v335_v58 = vsub.f32 1.0, %v334_v51  ;;  %v703_v63 = vadd.f32 1.0, %v588_v54  ;;  %595 = vpow2.f32 %v548_v53  ;;  %vm368_vm11 = vweird.f32 %v684_v43 }
  0xae   : > { %v306_v60 = vmul.f32 %v582_v44, %v305_v55  ;;  %597 = vrcp.f32 %v701_v62  ;;  %vm398_vm12 = vweird.f32 %v686_v46  ;;  %vm715_vm14 = vcmp.eq.f32.partialorder %v372_v61, 8.507059e+37 }
  0xaf   : > { %v336_v0 = vmul.f32 %v584_v48, %v335_v58  ;;  %v404_v11 = vand.u32 2147483648, %v686_v46  ;;  %599 = vrcp.f32 %v703_v63  ;;  %v375_v23 = vor.u32 1.1754944e-38, %v374_v4 }
  0xb0   : > { %v590_v2 = vpop.eup %589  ;;  %v307_v3 = vadd.f32 %v582_v44, %v306_v60  ;;  %vm727_vm15 = vcmp.eq.f32.partialorder %v402_v5, 8.507059e+37  ;;  %vm323_vm3 = vweird.f32 %v701_v62  ;;  %v357_v49 = vand.u32 2147483647, %v703_v63 }
  0xb1   : > { %v337_v6 = vadd.f32 %v584_v48, %v336_v0  ;;  %v364_v7 = vmul.f32 %v590_v2, %v684_v43  ;;  %v592_v8 = vpop.eup %591  ;;  %vm369_vm0 = vweird.f32 %v590_v2  ;;  %v405_v32 = vor.u32 1.1754944e-38, %v404_v11 }
  0xb2   : > { %v311_v9 = vsel %vm310_vm10, %v582_v44, %v307_v3  ;;  %v594_v12 = vpop.eup %593  ;;  %v394_v18 = vmul.f32 %v592_v8, %v686_v46  ;;  %vm399_vm1 = vweird.f32 %v592_v8  ;;  %vm370_vm2 = vmor %vm368_vm11, %vm369_vm0  ;;  %v329_v43 = vand.u32 2147483648, %v701_v62 }
  0xb3   : > { %v316_v13 = vsel %vm691_vm5, %v315_v57, %v311_v9  ;;  %v341_v14 = vsel %vm340_vm13, %v584_v48, %v337_v6  ;;  %v365_v17 = vsub.f32 1.0, %v364_v7  ;;  %v596_v27 = vpop.eup %595  ;;  %v739_v33 = vadd.f32 1.0, %v594_v12  ;;  %vm400_vm4 = vmor %vm398_vm12, %vm399_vm1 }
  0xb4   : > { %v423_v19 = vmul.f32 %v316_v13, %v662_v15  ;;  %v346_v20 = vsel %vm696_vm8, %v345_v1, %v341_v14  ;;  %v395_v15 = vsub.f32 1.0, %v394_v18  ;;  %v598_v30 = vpop.eup %597  ;;  %v749_v41 = vadd.f32 1.0, %v596_v27 }
  0xb5   : > { %v425_v28 = vmul.f32 %v346_v20, %v664_v16  ;;  %v366_v29 = vmul.f32 %v590_v2, %v365_v17  ;;  %v319_v38 = vmul.f32 %v598_v30, %v701_v62  ;;  %v600_v40 = vpop.eup %599  ;;  %v327_v16 = vand.u32 2147483647, %v701_v62 }
  0xb6   : > { %v431_v31 = vpack.c.bf16 %v423_v19, %v423_v19  ;;  %v396_v36 = vmul.f32 %v592_v8, %v395_v15  ;;  %601 = vrcp.f32 %v739_v33  ;;  %v349_v47 = vmul.f32 %v600_v40, %v703_v63 }
  0xb7   : > { %v433_v34 = vpack.c.bf16 %v425_v28, %v425_v28  ;;  %v367_v35 = vadd.f32 %v590_v2, %v366_v29  ;;  %v320_v45 = vsub.f32 1.0, %v319_v38  ;;  %vm324_vm5 = vweird.f32 %v598_v30 }
  0xb8   : > { %440 = vst.msk [vmem:[%s736_s29] sm:$0xf] %vm439_vm7, %v431_v31  ;;  %v397_v44 = vadd.f32 %v592_v8, %v396_v36  ;;  %v350_v53 = vsub.f32 1.0, %v349_v47  ;;  %vm354_vm6 = vweird.f32 %v600_v40  ;;  %v359_v55 = vand.u32 2147483648, %v703_v63  ;;  %vm325_vm8 = vmor %vm323_vm3, %vm324_vm5 }
  0xb9   : > { %442 = vst.msk [vmem:[%s736_s29 + $0x8] sm:$0xf] %vm439_vm7, %v433_v34  ;;  %v371_v42 = vsel %vm370_vm2, %v590_v2, %v367_v35  ;;  %v321_v52 = vmul.f32 %v598_v30, %v320_v45  ;;  %603 = vrcp.f32 %v749_v41  ;;  %vm328_vm9 = vcmp.eq.f32.partialorder %v327_v16, 8.507059e+37 }
  0xba   : > { %v376_v48 = vsel %vm715_vm14, %v375_v23, %v371_v42  ;;  %v401_v51 = vsel %vm400_vm4, %v592_v8, %v397_v44  ;;  %v351_v58 = vmul.f32 %v600_v40, %v350_v53  ;;  %vm353_vm10 = vweird.f32 %v703_v63 }
  0xbb   : > { %v427_v50 = vmul.f32 %v376_v48, %v668_v21  ;;  %v406_v54 = vsel %vm727_vm15, %v405_v32, %v401_v51  ;;  %v322_v57 = vadd.f32 %v598_v30, %v321_v52  ;;  %v330_v21 = vor.u32 1.1754944e-38, %v329_v43  ;;  %vm355_vm11 = vmor %vm353_vm10, %vm354_vm6 }
  0xbc   : > { %v429_v56 = vmul.f32 %v406_v54, %v670_v22  ;;  %v602_v59 = vpop.eup %601  ;;  %v352_v0 = vadd.f32 %v600_v40, %v351_v58  ;;  %v360_v2 = vor.u32 1.1754944e-38, %v359_v55  ;;  %vm358_vm12 = vcmp.eq.f32.partialorder %v357_v49, 8.507059e+37 }
  0xbd   : > { %v435_v46 = vpack.c.bf16 %v427_v50, %v427_v50  ;;  %v326_v61 = vsel %vm325_vm8, %v598_v30, %v322_v57  ;;  %v379_v1 = vmul.f32 %v602_v59, %v739_v33  ;;  %vm384_vm13 = vweird.f32 %v602_v59 }
  0xbe   : > { %v437_v60 = vpack.c.bf16 %v429_v56, %v429_v56  ;;  %v331_v22 = vsel %vm328_vm9, %v330_v21, %v326_v61  ;;  %v356_v3 = vsel %vm355_vm11, %v600_v40, %v352_v0  ;;  %v387_v6 = vand.u32 2147483647, %v739_v33 }
  0xbf   : > { %444 = vst.msk [vmem:[%s736_s29 + $0x10] sm:$0xf] %vm439_vm7, %v435_v46  ;;  %v424_v62 = vmul.f32 %v331_v22, %v672_v25  ;;  %v380_v4 = vsub.f32 1.0, %v379_v1  ;;  %v604_v63 = vpop.eup %603  ;;  %v361_v5 = vsel %vm358_vm12, %v360_v2, %v356_v3  ;;  %v389_v7 = vand.u32 2147483648, %v739_v33 }
  0xc0   : > { %446 = vst.msk [vmem:[%s736_s29 + $0x18] sm:$0xf] %vm439_vm7, %v437_v60  ;;  %v426_v9 = vmul.f32 %v361_v5, %v674_v26  ;;  %v409_v11 = vmul.f32 %v604_v63, %v749_v41  ;;  %vm383_vm14 = vweird.f32 %v739_v33  ;;  %vm388_vm0 = vcmp.eq.f32.partialorder %v387_v6, 8.507059e+37 }
  0xc1   : > { %v432_v8 = vpack.c.bf16 %v424_v62, %v424_v62  ;;  %v381_v10 = vmul.f32 %v602_v59, %v380_v4  ;;  %vm385_vm15 = vmor %vm383_vm14, %vm384_vm13  ;;  %v390_v14 = vor.u32 1.1754944e-38, %v389_v7  ;;  %v419_v17 = vand.u32 2147483648, %v749_v41 }
  0xc2   : > { %v434_v25 = vpack.c.bf16 %v426_v9, %v426_v9  ;;  %v410_v13 = vsub.f32 1.0, %v409_v11  ;;  %vm414_vm1 = vweird.f32 %v604_v63  ;;  %v417_v19 = vand.u32 2147483647, %v749_v41 }
  0xc3   : > { %441 = vst.msk [vmem:[%s736_s29 + $0x4] sm:$0xf] %vm439_vm7, %v432_v8  ;;  %v382_v12 = vadd.f32 %v602_v59, %v381_v10  ;;  %vm413_vm2 = vweird.f32 %v749_v41  ;;  %v420_v27 = vor.u32 1.1754944e-38, %v419_v17 }
  0xc4   : > { %443 = vst.msk [vmem:[%s736_s29 + $0xc] sm:$0xf] %vm439_vm7, %v434_v25  ;;  %v411_v26 = vmul.f32 %v604_v63, %v410_v13  ;;  %vm415_vm3 = vmor %vm413_vm2, %vm414_vm1  ;;  %vm418_vm4 = vcmp.eq.f32.partialorder %v417_v19, 8.507059e+37 }
  0xc5   : > { %v386_v18 = vsel %vm385_vm15, %v602_v59, %v382_v12 }
  0xc6   : > { %v391_v20 = vsel %vm388_vm0, %v390_v14, %v386_v18  ;;  %v412_v24 = vadd.f32 %v604_v63, %v411_v26 }
  0xc7   : > { %v428_v23 = vmul.f32 %v391_v20, %v680_v37 }
  0xc8   : > { %v416_v29 = vsel %vm415_vm3, %v604_v63, %v412_v24 }
  0xc9   : > { %v436_v28 = vpack.c.bf16 %v428_v23, %v428_v23  ;;  %v421_v15 = vsel %vm418_vm4, %v420_v27, %v416_v29 }
  0xca   : > { %v430_v30 = vmul.f32 %v421_v15, %v682_v39 }
  0xcb   : > { %445 = vst.msk [vmem:[%s736_s29 + $0x14] sm:$0xf] %vm439_vm7, %v436_v28 }
  0xcc   : > { %v438_v31 = vpack.c.bf16 %v430_v30, %v430_v30 }
  0xce   : > { %447 = vst.msk [vmem:[%s736_s29 + $0x1c] sm:$0xf] %vm439_vm7, %v438_v31 }
  0xcf PF: > { %s13_s12 = sadd.s32 1, %s611_s12  }
  0xd0   : > { %p10_p4 = scmp.ge.s32.totalorder %s13_s12, 4  }
  0xd2   :  { %12 = sbr.rel (!%p10_p4) target bundleno = 1 (0x1), region = 62 }

</bundles_post_ra>
